<compile_context>
chip_gen: v7x
topology: tpu7x:2x2x1
jax: 0.10.0
libtpu: 0.0.40
codegen_flags: <defaults>
</compile_context>

<pallas_src>
import jax
import jax.numpy as jnp
from jax.experimental import pallas as pl
from jax.experimental.pallas import tpu as pltpu


def _add_gaussian_noise_kernel(params_ref, x_ref, noise_ref, o_ref):
    """o = x + noise * std + mean,  params_ref = [mean, std] in SMEM."""
    mean = params_ref[0]
    std = params_ref[1]
    x = x_ref[...].astype(jnp.float32)
    noise = noise_ref[...]  # already float32 (torch.randn semantics)
    o_ref[...] = (x + noise * std + mean).astype(o_ref.dtype)


def add_gaussian_noise(x, key, mean=0.0, std=1.0, *, lane=1024, max_block_rows=512):
    """x: any-shape array (e.g. NCHW like PyTorch). Returns x + N(mean, std^2) noise."""
    orig_shape = x.shape
    total = x.size

    # Same semantics as torch.randn(tensor.size()): f32 standard normal.
    noise = jax.random.normal(key, orig_shape, dtype=jnp.float32)

    # ---- lay the problem out as a lane-dense (rows, lane) slab --------------
    rows = pl.cdiv(total, lane)
    if rows <= max_block_rows:
        block_rows = rows            # single block == full dim (always legal)
    else:
        block_rows = max_block_rows  # 512: multiple of 8, 2 MiB f32 tile
    n_blocks = pl.cdiv(rows, block_rows)
    rows_padded = n_blocks * block_rows
    padded_total = rows_padded * lane

    x_flat = x.reshape(total)
    noise_flat = noise.reshape(total)
    if padded_total != total:
        pad = padded_total - total
        x_flat = jnp.pad(x_flat, (0, pad))
        noise_flat = jnp.pad(noise_flat, (0, pad))
    x2d = x_flat.reshape(rows_padded, lane)
    noise2d = noise_flat.reshape(rows_padded, lane)

    # Runtime scalars in SMEM -> varying (mean, std) never recompiles.
    params = jnp.asarray([mean, std], dtype=jnp.float32)

    tile_spec = pl.BlockSpec((block_rows, lane), lambda i: (i, 0))
    out2d = pl.pallas_call(
        _add_gaussian_noise_kernel,
        out_shape=jax.ShapeDtypeStruct((rows_padded, lane), x.dtype),
        grid=(n_blocks,),
        in_specs=[
            pl.BlockSpec(memory_space=pltpu.MemorySpace.SMEM),  # [mean, std]
            tile_spec,                                          # x tile
            tile_spec,                                          # noise tile
        ],
        out_specs=tile_spec,
        input_output_aliases={1: 0},  # reuse x's slab buffer for the output
        compiler_params=pltpu.CompilerParams(
            dimension_semantics=("parallel",),
        ),
    )(params, x2d, noise2d)

    return out2d.reshape(padded_total)[:total].reshape(orig_shape)


if __name__ == "__main__":
    key = jax.random.PRNGKey(0)
    x_key, noise_key = jax.random.split(key)
    x = jax.random.normal(x_key, (2, 4, 16, 16), dtype=jnp.float32)

    mean, std = 0.5, 2.0
    out = add_gaussian_noise(x, noise_key, mean=mean, std=std)
    out = jax.block_until_ready(out)

    # Pure-JAX reference using the identical RNG draw.
    ref = x + jax.random.normal(noise_key, x.shape, dtype=jnp.float32) * std + mean

    assert out.shape == x.shape
    assert out.dtype == x.dtype
    assert bool(jnp.all(jnp.isfinite(out)))
    assert bool(jnp.allclose(out, ref, atol=1e-5, rtol=1e-5))
    # With std != 0 the output should differ from the input.
    assert bool(jnp.any(jnp.abs(out - x) > 0))

    print("KERNEL_OK")
</pallas_src>

<mosaic_0001>
module attributes {stable_mosaic.version = 11 : i64} {
  func.func @_add_gaussian_noise_kernel(%arg0: i32, %arg1: memref<2xf32, #tpu.memory_space<smem>>, %arg2: memref<2x1024xf32, #tpu.memory_space<vmem>>, %arg3: memref<2x1024xf32, #tpu.memory_space<vmem>>, %arg4: memref<2x1024xf32, #tpu.memory_space<vmem>>) attributes {dimension_semantics = [#tpu.dimension_semantics<parallel>], iteration_bounds = array<i64: 1>, scalar_prefetch = 0 : i64, scratch_operands = 0 : i64, tpu.core_type = #tpu.core_type<tc>, window_params = [{transform_indices = @transform_0, window_bounds = array<i64: 2>}, {transform_indices = @transform_1, window_bounds = array<i64: 2, 1024>}, {transform_indices = @transform_2, window_bounds = array<i64: 2, 1024>}, {transform_indices = @transform_3, window_bounds = array<i64: 2, 1024>}]} {
    %c0 = arith.constant 0 : index
    %0 = memref.load %arg1[%c0] : memref<2xf32, #tpu.memory_space<smem>>
    %c1 = arith.constant 1 : index
    %1 = memref.load %arg1[%c1] : memref<2xf32, #tpu.memory_space<smem>>
    %c0_0 = arith.constant 0 : index
    %c0_1 = arith.constant 0 : index
    %2 = vector.load %arg2[%c0_0, %c0_1] : memref<2x1024xf32, #tpu.memory_space<vmem>>, vector<2x1024xf32>
    %c0_2 = arith.constant 0 : index
    %c0_3 = arith.constant 0 : index
    %3 = vector.load %arg3[%c0_2, %c0_3] : memref<2x1024xf32, #tpu.memory_space<vmem>>, vector<2x1024xf32>
    %4 = vector.broadcast %1 : f32 to vector<2x1024xf32>
    %5 = arith.mulf %3, %4 : vector<2x1024xf32>
    %6 = arith.addf %2, %5 : vector<2x1024xf32>
    %7 = vector.broadcast %0 : f32 to vector<2x1024xf32>
    %8 = arith.addf %6, %7 : vector<2x1024xf32>
    %c0_4 = arith.constant 0 : index
    %c0_5 = arith.constant 0 : index
    %9 = vector.load %arg4[%c0_4, %c0_5] : memref<2x1024xf32, #tpu.memory_space<vmem>>, vector<2x1024xf32>
    tpu.vector_store %arg4[%c0_4, %c0_5], %8 {strides = array<i32>} : memref<2x1024xf32, #tpu.memory_space<vmem>>, vector<2x1024xf32>,
    return
  }
  func.func @transform_0(%arg0: i32) -> i32 {
    %c0_i32 = arith.constant 0 : i32
    %c0_i32_0 = arith.constant 0 : i32
    return %c0_i32 : i32
  }
  func.func @transform_1(%arg0: i32) -> (i32, i32) {
    %c0_i32 = arith.constant 0 : i32
    %c0_i32_0 = arith.constant 0 : i32
    return %arg0, %c0_i32 : i32, i32
  }
  func.func @transform_2(%arg0: i32) -> (i32, i32) {
    %c0_i32 = arith.constant 0 : i32
    %c0_i32_0 = arith.constant 0 : i32
    return %arg0, %c0_i32 : i32, i32
  }
  func.func @transform_3(%arg0: i32) -> (i32, i32) {
    %c0_i32 = arith.constant 0 : i32
    %c0_i32_0 = arith.constant 0 : i32
    return %arg0, %c0_i32 : i32, i32
  }
}

</mosaic_0001>

<bundles_post_ra>
// kernel: tpu_custom_call.1
= control target key start
LH: loop header
LB: loop body
LE: loop exit
PB: predicated region body
PF: predicated region fallthrough
CT: control target
= control target key end

     0   :  { %8 = vsyncpa [#allocation5], 0  ;;  %s194_s0 = inlined_call_operand.vmem [shape: f32[2], index: 0, kind: input, shape index: {}]   ;;  %s195_s1 = inlined_call_operand.hbm [shape: f32[2,1024], index: 1, kind: input, shape index: {}, may-alias: {1,3}]   ;;  %s196_s2 = inlined_call_operand.vmem [shape: f32[2,1024], index: 2, kind: input, shape index: {}]   ;;  %s197_s3 = inlined_call_operand.hbm [shape: f32[2,1024], index: 3, kind: output, shape index: {}, may-alias: {1,3}]  }
   0x1   :  { %9 = vsyncpa [#allocation3], 0 }
   0x2   :  { %10 = vsyncpa [#allocation4], 0  ;;  %s17_s14 = sshll.u32 %s194_s0, 4  ;;  %s18_s14 = int_to_ptr.vmem [resolvable:$true] %s17_s14 }
   0x3   :  { %s76_s15 = scalar_lea.vmem %s18_s14, 16  ;;  %p81_p1 = scmp.lt.s32.totalorder %s18_s14, %s18_s14 }
   0x4   :  { %p77_p0 = scmp.ne.s32.totalorder %s18_s14, %s76_s15  ;;  %p82_p2 = scmp.lt.s32.totalorder %s76_s15, %s76_s15 }
   0x6   :  { %p83_p3 = por %p82_p2, %p81_p1 }
   0x8   :  { %p84_p4 = pnand %p83_p3, %p77_p0 }
   0xa   :  { %87 = shalt.err (!%p84_p4)
}
   0xb   :  { %s138_s16 = smov [#allocation2]   ;;  %s139_s17 = smov [#allocation6]  }
   0xc   :  { %20 = dma.vmem_to_smem %s18_s14, 16, %s138_s16, [#allocation5]  }
   0xd   :  { %s27_s18 = sshll.u32 %s139_s17, 4  ;;  %s88_s21 = scalar_lea.hbm %s195_s1, 256  ;;  %s28_s18 = int_to_ptr.vmem [resolvable:$true] %s27_s18 }
   0xe   :  { %p89_p5 = scmp.ne.s32.totalorder %s195_s1, %s88_s21  ;;  %p92_p6 = scmp.lt.u32.totalorder %s88_s21, %s195_s1 }
  0x10   :  { %p94_p7 = pnand %p92_p6, %p89_p5 }
  0x12   :  { %97 = shalt.err (!%p94_p7)
}
  0x13   :  { %s98_s25 = scalar_lea.vmem %s28_s18, 256  ;;  %p103_p9 = scmp.lt.s32.totalorder %s28_s18, %s28_s18 }
  0x14   :  { %p99_p8 = scmp.ne.s32.totalorder %s28_s18, %s98_s25  ;;  %p104_p10 = scmp.lt.s32.totalorder %s98_s25, %s98_s25 }
  0x16   :  { %p105_p11 = por %p104_p10, %p103_p9 }
  0x18   :  { %p106_p12 = pnand %p105_p11, %p99_p8 }
  0x1a   :  { %109 = shalt.err (!%p106_p12)
}
  0x1b   :  { %30 = dma.hbm_to_vmem [thread:$0]  %s195_s1, 256, %s28_s18, [#allocation3]  }
  0x1c   :  { %132 = dma.done.wait [#allocation5], 16  }
  0x1d   :  { %133 = vsyncadd [#allocation5], 4294967280 }
  0x1e   :  { %134 = dma.done.wait [#allocation3], 256  }
  0x1f   :  { %135 = vsyncadd [#allocation3], 4294967040 }
  0x20   :  { %39 = sfence }
  0x21   :  { %s40_s28 = sld [smem:[#allocation2]]  ;;  %s72_s29 = sld [smem:[#allocation2 + $0x1]]  ;;  %v44_v0 = vld [vmem:[%s196_s2] sm:$0xff]  ;;  %v45_v1 = vld [vmem:[%s196_s2 + $0x8] sm:$0xff] }
  0x22   :  { %v42_v2 = vld [vmem:[#allocation6] sm:$0xff]  ;;  %v43_v4 = vld [vmem:[#allocation6 + $0x8] sm:$0xff]  ;;  %s140_s1 = smov [#allocation7]  }
  0x23   :  { %s62_s7 = sshll.u32 %s140_s1, 4  ;;  %s63_s7 = int_to_ptr.vmem [resolvable:$true] %s62_s7 }
  0x24   :  { %s110_s8 = scalar_lea.vmem %s63_s7, 256  ;;  %p115_p0 = scmp.lt.s32.totalorder %s63_s7, %s63_s7 }
  0x25   :  { %p111_p13 = scmp.ne.s32.totalorder %s63_s7, %s110_s8  ;;  %p116_p1 = scmp.lt.s32.totalorder %s110_s8, %s110_s8 }
  0x27   :  { %v46_v3 = vstv %s72_s29  ;;  %v51_v7 = vstv %s40_s28  ;;  %p117_p2 = por %p116_p1, %p115_p0 }
  0x28   :  { %v47_v5 = vmul.f32 %v46_v3, %v44_v0  ;;  %v48_v6 = vmul.f32 %v46_v3, %v45_v1 }
  0x29   :  { %p118_p3 = pnand %p117_p2, %p111_p13 }
  0x2a   :  { %v49_v8 = vadd.f32 %v47_v5, %v42_v2  ;;  %v50_v9 = vadd.f32 %v48_v6, %v43_v4 }
  0x2c   :  { %v52_v10 = vadd.f32 %v51_v7, %v49_v8  ;;  %v53_v11 = vadd.f32 %v51_v7, %v50_v9 }
  0x2e   :  { %54 = vst [vmem:[#allocation7] sm:$0xff] %v52_v10  ;;  %55 = vst [vmem:[#allocation7 + $0x8] sm:$0xff] %v53_v11 }
  0x2f   :  { %121 = shalt.err (!%p118_p3)
}
  0x30   :  { %s122_s10 = scalar_lea.hbm %s197_s3, 256 }
  0x31   :  { %p123_p4 = scmp.ne.s32.totalorder %s197_s3, %s122_s10  ;;  %p126_p5 = scmp.lt.u32.totalorder %s122_s10, %s197_s3 }
  0x33   :  { %p128_p6 = pnand %p126_p5, %p123_p4 }
  0x35   :  { %131 = shalt.err (!%p128_p6)
}
  0x36   :  { %65 = dma.vmem_to_hbm [thread:$0]  %s63_s7, 256, %s197_s3, [#allocation4]  }
  0x37   :  { %136 = dma.done.wait [#allocation4], 256  }
  0x38   :  { %137 = vsyncadd [#allocation4], 4294967040 }
  0x39   :  { %69 = vsyncpa [#allocation3], 1 }
  0x3a   :  { %70 = vsyncpa [#allocation4], 1 }
  0x3b   :  { %71 = vsyncpa [#allocation5], 1 }

</bundles_post_ra>
